<compile_context>
chip_gen: v6e
topology: v6e:2x2x1
jax: 0.10.0
libtpu: 0.0.40
codegen_flags: <defaults>
</compile_context>

<pallas_src>
import jax
import jax.numpy as jnp
from jax.experimental import pallas as pl
from jax.experimental.pallas import tpu as pltpu

HIDDEN = 64
TB_MAX = 4096  # max batch-tile rows; per-step VMEM stays ~1.5 MiB even at this size


def _round_up(x, m):
    return ((x + m - 1) // m) * m


def ethics_kernel(x_ref, w1_ref, b1_ref, w2_ref, b2_ref, o_ref):
    # x_ref:  [tb, D] f32   (batch rows on the sublane axis)
    # w1_ref: [D, H]  bf16
    # b1_ref: [1, H]  f32
    # w2_ref: [H, E]  f32
    # b2_ref: [1, E]  f32
    # o_ref:  [tb, E] f32
    x = x_ref[...].astype(jnp.bfloat16)          # free VPU cast; no extra HBM pass
    h = jnp.dot(x, w1_ref[...], preferred_element_type=jnp.float32)
    h = jnp.maximum(h + b1_ref[...], 0.0)
    z = jnp.dot(h, w2_ref[...], preferred_element_type=jnp.float32) + b2_ref[...]
    o_ref[...] = jax.nn.sigmoid(z).astype(o_ref.dtype)


def ethics_forward(decision, w1, b1, w2, b2, *, tb=None):
    """decision: [B, decision_size] f32 -> ethic_score: [B, ethic_size] f32.

    Equivalent to sigmoid(relu(decision @ w1 + b1) @ w2 + b2), fused in one kernel.
    1-D grid over batch tiles; weights/biases held VMEM-resident across steps.
    """
    B, D = decision.shape
    H = w1.shape[1]
    E = w2.shape[1]

    if tb is None:
        # Big tiles amortize per-step overhead; aim for >= 2 (even) tiles when the
        # batch is large enough so the "parallel" axis engages both TCs on v7x.
        tb = min(TB_MAX, _round_up(max(1, -(-B // 2)), 8))
    # Block rows land on the sublane axis -> multiple of 8; don't exceed the batch.
    tb = max(8, _round_up(min(tb, _round_up(B, 8)), 8))
    n_tiles = pl.cdiv(B, tb)

    # One-time tiny wrapper ops on the (small) parameters only.
    x = decision.astype(jnp.float32)             # [B, D]  (no pad / no transpose)
    w1b = w1.astype(jnp.bfloat16)                # [D, H]
    b1r = b1.reshape(1, H).astype(jnp.float32)   # [1, H]
    w2f = w2.astype(jnp.float32)                 # [H, E]
    b2r = b2.reshape(1, E).astype(jnp.float32)   # [1, E]

    flops = 2 * B * (D * H + H * E)
    transcendentals = 2 * B * E                  # sigmoid = exp + reciprocal
    bytes_accessed = (B * D * 4                  # x read (f32, once)
                      + w1b.size * 2 + (b1r.size + w2f.size + b2r.size) * 4
                      + B * E * 4)               # output write (f32, once)

    out = pl.pallas_call(
        ethics_kernel,
        out_shape=jax.ShapeDtypeStruct((B, E), jnp.float32),
        grid=(n_tiles,),
        in_specs=[
            pl.BlockSpec((tb, D), lambda i: (i, 0)),   # x streams over batch tiles
            pl.BlockSpec((D, H), lambda i: (0, 0)),    # weights/biases stay resident
            pl.BlockSpec((1, H), lambda i: (0, 0)),
            pl.BlockSpec((H, E), lambda i: (0, 0)),
            pl.BlockSpec((1, E), lambda i: (0, 0)),
        ],
        out_specs=pl.BlockSpec((tb, E), lambda i: (i, 0)),
        compiler_params=pltpu.CompilerParams(
            dimension_semantics=("parallel",),
            vmem_limit_bytes=32 << 20,
        ),
        cost_estimate=pl.CostEstimate(
            flops=flops, transcendentals=transcendentals,
            bytes_accessed=bytes_accessed),
    )(x, w1b, b1r, w2f, b2r)

    return out                                   # [B, E] f32


def init_ethics_params(key, decision_size, ethic_size, hidden=HIDDEN):
    """Deterministic init mimicking nn.Linear's uniform(-1/sqrt(fan_in), 1/sqrt(fan_in))."""
    k1, k2, k3, k4 = jax.random.split(key, 4)
    lim1 = 1.0 / jnp.sqrt(decision_size)
    lim2 = 1.0 / jnp.sqrt(hidden)
    w1 = jax.random.uniform(k1, (decision_size, hidden), jnp.float32, -lim1, lim1)
    b1 = jax.random.uniform(k2, (1, hidden), jnp.float32, -lim1, lim1)
    w2 = jax.random.uniform(k3, (hidden, ethic_size), jnp.float32, -lim2, lim2)
    b2 = jax.random.uniform(k4, (1, ethic_size), jnp.float32, -lim2, lim2)
    return w1, b1, w2, b2


if __name__ == "__main__":
    key = jax.random.PRNGKey(0)
    k_params, k_x1, k_x2 = jax.random.split(key, 3)

    decision_size = 32
    ethic_size = 16
    w1, b1, w2, b2 = init_ethics_params(k_params, decision_size, ethic_size)

    def reference(x):
        return jax.nn.sigmoid(jnp.maximum(x @ w1 + b1, 0.0) @ w2 + b2)

    # Small batch: single (ragged-safe) tile.
    x_small = jax.random.normal(k_x1, (8, decision_size), jnp.float32)
    out_small = jax.block_until_ready(ethics_forward(x_small, w1, b1, w2, b2))
    assert out_small.shape == (8, ethic_size)
    assert jnp.all(jnp.isfinite(out_small))
    assert jnp.allclose(out_small, reference(x_small), atol=2e-2), "small-batch mismatch"

    # Non-multiple batch exercising multiple grid steps + a ragged final tile.
    x_big = jax.random.normal(k_x2, (300, decision_size), jnp.float32)
    out_big = jax.block_until_ready(ethics_forward(x_big, w1, b1, w2, b2, tb=128))
    assert out_big.shape == (300, ethic_size)
    assert jnp.all(jnp.isfinite(out_big))
    assert jnp.allclose(out_big, reference(x_big), atol=2e-2), "multi-tile mismatch"

    # Default (auto) tiling path on the same non-multiple batch.
    out_auto = jax.block_until_ready(ethics_forward(x_big, w1, b1, w2, b2))
    assert jnp.allclose(out_auto, reference(x_big), atol=2e-2), "auto-tile mismatch"

    print("KERNEL_OK")
</pallas_src>

<mosaic_0001>
module attributes {stable_mosaic.version = 11 : i64} {
  func.func @ethics_kernel(%arg0: i32, %arg1: memref<8x32xf32, #tpu.memory_space<vmem>>, %arg2: memref<32x64xbf16, #tpu.memory_space<vmem>>, %arg3: memref<1x64xf32, #tpu.memory_space<vmem>>, %arg4: memref<64x16xf32, #tpu.memory_space<vmem>>, %arg5: memref<1x16xf32, #tpu.memory_space<vmem>>, %arg6: memref<8x16xf32, #tpu.memory_space<vmem>>) attributes {dimension_semantics = [#tpu.dimension_semantics<parallel>], iteration_bounds = array<i64: 1>, scalar_prefetch = 0 : i64, scratch_operands = 0 : i64, tpu.core_type = #tpu.core_type<tc>, window_params = [{transform_indices = @transform_0, window_bounds = array<i64: 8, 32>}, {pipeline_mode = #tpu.pipeline_mode<synchronous>, transform_indices = @transform_1, window_bounds = array<i64: 32, 64>}, {pipeline_mode = #tpu.pipeline_mode<synchronous>, transform_indices = @transform_2, window_bounds = array<i64: 1, 64>}, {pipeline_mode = #tpu.pipeline_mode<synchronous>, transform_indices = @transform_3, window_bounds = array<i64: 64, 16>}, {pipeline_mode = #tpu.pipeline_mode<synchronous>, transform_indices = @transform_4, window_bounds = array<i64: 1, 16>}, {transform_indices = @transform_5, window_bounds = array<i64: 8, 16>}]} {
    %c0 = arith.constant 0 : index
    %c0_0 = arith.constant 0 : index
    %0 = vector.load %arg1[%c0, %c0_0] : memref<8x32xf32, #tpu.memory_space<vmem>>, vector<8x32xf32>
    %1 = arith.truncf %0 : vector<8x32xf32> to vector<8x32xbf16>
    %c0_1 = arith.constant 0 : index
    %c0_2 = arith.constant 0 : index
    %2 = vector.load %arg2[%c0_1, %c0_2] : memref<32x64xbf16, #tpu.memory_space<vmem>>, vector<32x64xbf16>
    %cst = arith.constant dense<0.000000e+00> : vector<8x64xf32>
    %3 = tpu.matmul %1, %2, %cst {dimension_numbers = #tpu.dot_dimension_numbers<[1], [0], [0], [1], [0, 0, 1, 1], [], []>} : vector<8x32xbf16>, vector<32x64xbf16>, vector<8x64xf32> -> vector<8x64xf32>
    %c0_3 = arith.constant 0 : index
    %c0_4 = arith.constant 0 : index
    %4 = vector.load %arg3[%c0_3, %c0_4] : memref<1x64xf32, #tpu.memory_space<vmem>>, vector<1x64xf32>
    %5 = vector.broadcast %4 : vector<1x64xf32> to vector<8x64xf32>
    %6 = arith.addf %3, %5 : vector<8x64xf32>
    %cst_5 = arith.constant 0.000000e+00 : f32
    %7 = vector.broadcast %cst_5 : f32 to vector<8x64xf32>
    %8 = arith.maximumf %6, %7 : vector<8x64xf32>
    %c0_6 = arith.constant 0 : index
    %c0_7 = arith.constant 0 : index
    %9 = vector.load %arg4[%c0_6, %c0_7] : memref<64x16xf32, #tpu.memory_space<vmem>>, vector<64x16xf32>
    %cst_8 = arith.constant dense<0.000000e+00> : vector<8x16xf32>
    %10 = tpu.matmul %8, %9, %cst_8 {dimension_numbers = #tpu.dot_dimension_numbers<[1], [0], [0], [1], [0, 0, 1, 1], [], []>} : vector<8x64xf32>, vector<64x16xf32>, vector<8x16xf32> -> vector<8x16xf32>
    %c0_9 = arith.constant 0 : index
    %c0_10 = arith.constant 0 : index
    %11 = vector.load %arg5[%c0_9, %c0_10] : memref<1x16xf32, #tpu.memory_space<vmem>>, vector<1x16xf32>
    %12 = vector.broadcast %11 : vector<1x16xf32> to vector<8x16xf32>
    %13 = arith.addf %10, %12 : vector<8x16xf32>
    %14 = arith.negf %13 : vector<8x16xf32>
    %15 = math.exp %14 : vector<8x16xf32>
    %cst_11 = arith.constant 1.000000e+00 : f32
    %16 = vector.broadcast %cst_11 : f32 to vector<8x16xf32>
    %17 = arith.addf %16, %15 : vector<8x16xf32>
    %18 = arith.divf %16, %17 : vector<8x16xf32>
    %c0_12 = arith.constant 0 : index
    %c0_13 = arith.constant 0 : index
    %19 = vector.load %arg6[%c0_12, %c0_13] : memref<8x16xf32, #tpu.memory_space<vmem>>, vector<8x16xf32>
    tpu.vector_store %arg6[%c0_12, %c0_13], %18 {strides = array<i32>} : memref<8x16xf32, #tpu.memory_space<vmem>>, vector<8x16xf32>,
    return
  }
  func.func @transform_0(%arg0: i32) -> (i32, i32) {
    %c0_i32 = arith.constant 0 : i32
    %c0_i32_0 = arith.constant 0 : i32
    return %arg0, %c0_i32 : i32, i32
  }
  func.func @transform_1(%arg0: i32) -> (i32, i32) {
    %c0_i32 = arith.constant 0 : i32
    %c0_i32_0 = arith.constant 0 : i32
    %c0_i32_1 = arith.constant 0 : i32
    return %c0_i32, %c0_i32_0 : i32, i32
  }
  func.func @transform_2(%arg0: i32) -> (i32, i32) {
    %c0_i32 = arith.constant 0 : i32
    %c0_i32_0 = arith.constant 0 : i32
    %c0_i32_1 = arith.constant 0 : i32
    return %c0_i32, %c0_i32_0 : i32, i32
  }
  func.func @transform_3(%arg0: i32) -> (i32, i32) {
    %c0_i32 = arith.constant 0 : i32
    %c0_i32_0 = arith.constant 0 : i32
    %c0_i32_1 = arith.constant 0 : i32
    return %c0_i32, %c0_i32_0 : i32, i32
  }
  func.func @transform_4(%arg0: i32) -> (i32, i32) {
    %c0_i32 = arith.constant 0 : i32
    %c0_i32_0 = arith.constant 0 : i32
    %c0_i32_1 = arith.constant 0 : i32
    return %c0_i32, %c0_i32_0 : i32, i32
  }
  func.func @transform_5(%arg0: i32) -> (i32, i32) {
    %c0_i32 = arith.constant 0 : i32
    %c0_i32_0 = arith.constant 0 : i32
    return %arg0, %c0_i32 : i32, i32
  }
}

</mosaic_0001>

<bundles_post_ra>
// kernel: tpu_custom_call.1
= control target key start
LH: loop header
LB: loop body
LE: loop exit
PB: predicated region body
PF: predicated region fallthrough
CT: control target
= control target key end

     0   :  { %v280_v1 = vmov 0.0   ;;  %vm281_vm0 = vmmov 0   ;;  %s355_s0 = inlined_call_operand.vmem [shape: f32[8,32], index: 0, kind: input, shape index: {}]   ;;  %s356_s1 = inlined_call_operand.vmem [shape: bf16[32,64], index: 1, kind: input, shape index: {}]   ;;  %s357_s2 = inlined_call_operand.vmem [shape: f32[1,64], index: 2, kind: input, shape index: {}]   ;;  %s358_s3 = inlined_call_operand.vmem [shape: f32[64,16], index: 3, kind: input, shape index: {}]   ;;  %s359_s4 = inlined_call_operand.vmem [shape: f32[1,16], index: 4, kind: input, shape index: {}]   ;;  %s360_s5 = inlined_call_operand.hbm [shape: f32[8,16], index: 5, kind: output, shape index: {}]  }
   0x1   :  { %v252_v0 = vld [vmem:[%s356_s1 + $0x8] sm:$0xff]   ;;  %222 = vmatprep.subr.bf16.mxu0 %v280_v1  ;;  %v253_v2 = vld [vmem:[%s356_s1] sm:$0xff]   ;;  %230 = vmatprep.subr.mxu1 %v280_v1  ;;  %v99_v4 = vld [vmem:[%s358_s3 + $0x38] sm:$0xff] }
   0x2   :  { %223 = vmatpush3.bf16.msra.mxu0 %v252_v0  ;;  %226 = vmatprep.mubr.msk.bf16.mxu0 %vm281_vm0, %v280_v1  ;;  %v22_v3 = vld [vmem:[%s355_s0] sm:$0xff]  ;;  %v98_v5 = vld [vmem:[%s358_s3 + $0x30] sm:$0xff]  ;;  %v97_v6 = vld [vmem:[%s358_s3 + $0x28] sm:$0xff] }
   0x3   :  { %224 = vmatprep.subr.bf16.mxu0 %v280_v1  ;;  %231 = vmatpush3.msra.mxu1 %v99_v4 }
   0x4   :  { %232 = vmatprep.subr.mxu1 %v280_v1  ;;  %246 = vmatprep.mubr.msk.f32.mxu1 %vm281_vm0, %v280_v1 }
   0x5   :  { %10 = vsyncpa [#allocation3], 0  ;;  %v23_v7 = vpack.c.bf16 %v22_v3, %v22_v3  ;;  %233 = vmatpush3.msra.mxu1 %v98_v5  ;;  %vm47_vm1 = vcmask 261120   ;;  %v96_v8 = vld [vmem:[%s358_s3 + $0x20] sm:$0xff]  ;;  %v95_v9 = vld [vmem:[%s358_s3 + $0x18] sm:$0xff]  ;;  %vm107_vm2 = vcmask 523264  }
   0x6   :  { %225 = vmatpush3.bf16.msra.mxu0 %v253_v2  ;;  %234 = vmatprep.subr.mxu1 %v280_v1  ;;  %v94_v10 = vld [vmem:[%s358_s3 + $0x10] sm:$0xff]  ;;  %v93_v11 = vld [vmem:[%s358_s3 + $0x8] sm:$0xff]  ;;  %v92_v12 = vld [vmem:[%s358_s3] sm:$0xff]  ;;  %vm187_vm3 = vcmask 130048  }
   0x7   :  { %235 = vmatpush3.msra.mxu1 %v97_v6  ;;  %v203_v13 = vld [vmem:[%s357_s2] ss:$0 sm:$0xff]  ;;  %s282_s2 = smov [#allocation2]  }
   0x8   :  { %236 = vmatprep.subr.mxu1 %v280_v1  ;;  %v207_v20 = vld [vmem:[%s359_s4] ss:$0 sm:$0xff]  ;;  %s195_s3 = sshll.u32 %s282_s2, 4  ;;  %s196_s3 = int_to_ptr.vmem [resolvable:$true] %s195_s3 }
   0x9   :  { %227 = vmatmul.mubr.msk.bf16.vlgmr.msra.gmra.mxu0 %vm47_vm1, %v23_v7  ;;  %237 = vmatpush3.msra.mxu1 %v96_v8  ;;  %s258_s17 = scalar_lea.vmem %s196_s3, 128  ;;  %p263_p1 = scmp.lt.s32.totalorder %s196_s3, %s196_s3 }
   0xa   :  { %238 = vmatprep.subr.mxu1 %v280_v1  ;;  %p259_p0 = scmp.ne.s32.totalorder %s196_s3, %s258_s17  ;;  %p264_p2 = scmp.lt.s32.totalorder %s258_s17, %s258_s17 }
   0xb   :  { %239 = vmatpush3.msra.mxu1 %v95_v9 }
   0xc   :  { %240 = vmatprep.subr.mxu1 %v280_v1  ;;  %p265_p3 = por %p264_p2, %p263_p1 }
   0xd   :  { %241 = vmatpush3.msra.mxu1 %v94_v10 }
   0xe   :  { %242 = vmatprep.subr.mxu1 %v280_v1  ;;  %p266_p4 = pnand %p265_p3, %p259_p0 }
   0xf   :  { %243 = vmatpush3.msra.mxu1 %v93_v11 }
  0x10   :  { %244 = vmatprep.subr.mxu1 %v280_v1 }
  0x11   :  { %245 = vmatpush3.msra.mxu1 %v92_v12 }
  0xc9   :  { %v85_v14 = vpop.f32.mrf.mxu0 }
  0xca   :  { %v86_v15 = vadd.f32 %v203_v13, %v85_v14 }
  0xcb   :  { %v228_v16 = vpop.f32.mrf.mxu0 }
  0xcc   :  { %v91_v17 = vmax.f32 %v86_v15, 0.0 }
  0xcd   :  { %v88_v18 = vpop.f32.mrf.mxu0 }
  0xce   :  { %247 = vmatmul.mubr.msk.f32.vlgmr.msra.gmra.mxu1 %vm107_vm2, %v91_v17 }
  0xcf   :  { %v229_v19 = vpop.f32.mrf.mxu0 }
 0x18e   :  { %v177_v21 = vpop.f32.mrf.mxu1 }
 0x18f   :  { %v178_v22 = vadd.f32 %v207_v20, %v177_v21 }
 0x190   :  { %v248_v23 = vpop.f32.mrf.mxu1 }
 0x191   :  { %v209_v24 = vmul.f32 -1.442695, %v178_v22 }
 0x193   :  { %254 = vpow2.f32 %v209_v24 }
 0x1a0   :  { %v255_v25 = vpop.eup %254 }
 0x1a1   :  { %v184_v26 = vadd.f32 1.0, %v255_v25 }
 0x1a3   :  { %256 = vrcp.f32 %v184_v26 }
 0x1b0   :  { %v257_v27 = vpop.eup %256 }
 0x1b1   :  { %188 = vst.msk [vmem:[#allocation2] sm:$0xff] %vm187_vm3, %v257_v27 }
 0x1b2   :  { %269 = shalt.err (!%p266_p4)
}
 0x1b3   :  { %198 = dma.vmem_to_hbm [thread:$0]  %s196_s3, 128, %s360_s5, [#allocation3]  }
 0x1b4   :  { %278 = dma.done.wait [#allocation3], 128  }
 0x1b5   :  { %279 = vsyncadd [#allocation3], 4294967168 }
 0x1b6   :  { %202 = vsyncpa [#allocation3], 1 }

</bundles_post_ra>
